<compile_context>
chip_gen: v7x
topology: tpu7x:2x2x1
jax: 0.10.0
libtpu: 0.0.40
codegen_flags: <defaults>
</compile_context>

<pallas_src>
import numpy as np
import jax
import jax.numpy as jnp
from jax import lax
from jax.experimental import pallas as pl
from jax.experimental.pallas import tpu as pltpu


def _round_up(x, m):
    return ((x + m - 1) // m) * m


def gcn_agg_kernel(mask_ref, x_ref, rowinv_ref, out_ref, acc_ref):
    """out[i, j] = row_inv[i] * sum_k mask[i, k] * x_colscaled[k, j]."""
    k = pl.program_id(2)

    @pl.when(k == 0)
    def _init():
        acc_ref[...] = jnp.zeros_like(acc_ref)

    # Pure bf16 MXU matmul with f32 accumulation; the column normalization was
    # pre-folded into the x tile on the wrapper side, so no per-tile VALU work.
    acc_ref[...] += jnp.dot(mask_ref[...], x_ref[...],
                            preferred_element_type=jnp.float32)

    @pl.when(k == pl.num_programs(2) - 1)
    def _finalize():
        # Row (degree) normalization applied once on the f32 accumulator.
        out_ref[...] = (acc_ref[...] * rowinv_ref[...]).astype(out_ref.dtype)


def gcn_aggregate(mask, x, row_deg=None, col_deg=None, *,
                  tb=512, tf=256, tu=1024,
                  compute_dtype=jnp.bfloat16, out_dtype=jnp.float32):
    """Pallas implementation of GCNAggregator.forward's numeric core.

    mask:    (B, U) binary membership matrix (int8/any), neighbors incl. self-loops
    x:       (U, F) features of the unique nodes (embed_matrix)
    row_deg: (B,) row degrees (optional, host-computed for free)
    col_deg: (U,) column degrees (optional, host-computed for free)
    returns (B, F) float32:  D_r^{-1/2} . mask . D_c^{-1/2} @ x
    """
    B, U = mask.shape
    U2, F = x.shape
    assert U == U2

    # --- degrees: prefer host-provided (free byproducts of the set construction);
    # fallback keeps the wrapper usable standalone.
    if row_deg is None:
        row_deg = jnp.sum(mask.astype(jnp.float32), axis=1)
    if col_deg is None:
        col_deg = jnp.sum(mask.astype(jnp.float32), axis=0)
    row_deg = jnp.asarray(row_deg, jnp.float32)
    col_deg = jnp.asarray(col_deg, jnp.float32)
    row_inv = jnp.where(row_deg > 0, lax.rsqrt(row_deg), 0.0)     # (B,)
    col_inv = jnp.where(col_deg > 0, lax.rsqrt(col_deg), 0.0)     # (U,)

    # --- generation-aware VMEM budget (v7x: 64 MiB per TC, v5e/v6e: 128 MiB).
    try:
        vmem_cap = int(pltpu.get_tpu_info().vmem_capacity_bytes)
    except Exception:
        vmem_cap = 64 * 1024 * 1024        # conservative (v7x) fallback
    budget = (vmem_cap * 3) // 4

    cbytes = np.dtype(compute_dtype).itemsize
    obytes = np.dtype(out_dtype).itemsize

    def _footprint(tb_, tu_, tf_):
        return (2 * tb_ * tu_ * cbytes      # mask tile, double-buffered
                + 2 * tu_ * tf_ * cbytes    # x tile, double-buffered
                + 2 * tb_ * tf_ * obytes    # out tile, double-buffered
                + tb_ * tf_ * 4             # f32 accumulator scratch
                + 2 * tb_ * 4)              # row_inv tile

    # Shrink tile caps until the double-buffered footprint fits the budget.
    while _footprint(min(tb, _round_up(B, 8)),
                     min(tu, _round_up(U, 128)),
                     min(tf, _round_up(F, 128))) > budget:
        if tu > 128:
            tu //= 2
        elif tf > 128:
            tf //= 2
        elif tb > 8:
            tb //= 2
        else:
            break

    # --- tile sizes minimizing padding waste on ragged shapes.
    nb = pl.cdiv(B, tb)
    nu = pl.cdiv(U, tu)
    nf = pl.cdiv(F, tf)
    # v7x has 2 TensorCores: make sure there are >= 2 "parallel" tiles when possible.
    if nb * nf == 1 and B > 8:
        nb = 2
    tb_eff = _round_up(pl.cdiv(B, nb), 8)      # sublane-aligned
    tu_eff = _round_up(pl.cdiv(U, nu), 128)    # lane (mask) / sublane (x) aligned
    tf_eff = _round_up(pl.cdiv(F, nf), 128)    # lane-dense output
    b_p, u_p, f_p = nb * tb_eff, nu * tu_eff, nf * tf_eff

    vmem_limit = int(min(budget,
                         max(32 * 1024 * 1024,
                             2 * _footprint(tb_eff, tu_eff, tf_eff))))

    # --- padded, casted operands. Column normalization folded into x here, fused
    # into the same pad/cast pass the wrapper already pays for.
    mask_p = jnp.zeros((b_p, u_p), compute_dtype).at[:B, :U].set(
        mask.astype(compute_dtype))
    x_p = jnp.zeros((u_p, f_p), compute_dtype).at[:U, :F].set(
        (x.astype(jnp.float32) * col_inv[:, None]).astype(compute_dtype))
    row_inv_p = jnp.zeros((b_p, 1), jnp.float32).at[:B, 0].set(row_inv)

    grid = (nb, nf, nu)                       # reduction (U) axis last

    out_p = pl.pallas_call(
        gcn_agg_kernel,
        out_shape=jax.ShapeDtypeStruct((b_p, f_p), out_dtype),
        grid_spec=pltpu.PrefetchScalarGridSpec(
            num_scalar_prefetch=0,
            grid=grid,
            in_specs=[
                pl.BlockSpec((tb_eff, tu_eff), lambda i, j, k: (i, k)),  # mask
                pl.BlockSpec((tu_eff, tf_eff), lambda i, j, k: (k, j)),  # col-scaled x
                pl.BlockSpec((tb_eff, 1),      lambda i, j, k: (i, 0)),  # row_inv
            ],
            out_specs=pl.BlockSpec((tb_eff, tf_eff), lambda i, j, k: (i, j)),
            scratch_shapes=[pltpu.VMEM((tb_eff, tf_eff), jnp.float32)],
        ),
        compiler_params=pltpu.CompilerParams(
            dimension_semantics=("parallel", "parallel", "arbitrary"),
            vmem_limit_bytes=vmem_limit,
        ),
    )(mask_p, x_p, row_inv_p)

    return out_p[:B, :F]


def build_mask_and_features(nodes, to_neighs, features_np):
    """Host-side preprocessing mirroring GCNAggregator.forward's Python set / dict
    logic (dynamic set union + index remapping: no clean Pallas equivalent).
    Also emits degrees (free byproducts) and an int8 mask (4x smaller transfer)."""
    samp_neighs = [set(neighs) | {int(nodes[i])} for i, neighs in enumerate(to_neighs)]
    unique_nodes_list = list(set.union(*samp_neighs))
    unique_nodes = {n: i for i, n in enumerate(unique_nodes_list)}
    B, U = len(samp_neighs), len(unique_nodes_list)
    mask = np.zeros((B, U), dtype=np.int8)
    col = [unique_nodes[n] for sn in samp_neighs for n in sn]
    row = [i for i in range(B) for _ in samp_neighs[i]]
    mask[row, col] = 1
    row_deg = np.asarray([len(sn) for sn in samp_neighs], dtype=np.float32)
    col_deg = np.bincount(np.asarray(col), minlength=U).astype(np.float32)
    embed = features_np[np.asarray(unique_nodes_list, dtype=np.int64)]
    return (jnp.asarray(mask), jnp.asarray(embed),
            jnp.asarray(row_deg), jnp.asarray(col_deg))


if __name__ == "__main__":
    # Small synthetic graph consistent with the module's forward.
    N_TOTAL, FEAT, BATCH = 40, 20, 10

    key = jax.random.PRNGKey(0)
    k_feat, k_adj = jax.random.split(key)

    features = jax.random.normal(k_feat, (N_TOTAL, FEAT), jnp.float32)

    # Random neighbor sets for the BATCH selected nodes (module inputs).
    adj_prob = np.asarray(jax.random.uniform(k_adj, (BATCH, N_TOTAL)))
    nodes = list(range(BATCH))
    to_neighs = [set(np.nonzero(adj_prob[i] < 0.2)[0].tolist()) for i in range(BATCH)]

    mask_i8, embed, row_deg, col_deg = build_mask_and_features(
        nodes, to_neighs, np.asarray(features))

    out = gcn_aggregate(mask_i8, embed, row_deg, col_deg)
    out = jax.block_until_ready(out)

    # Pure-f32 reference == PyTorch forward: (mask / sqrt(rowsum) / sqrt(colsum)) @ embed
    mask_f32 = mask_i8.astype(jnp.float32)
    row_sum = jnp.sum(mask_f32, axis=1, keepdims=True)
    col_sum = jnp.sum(mask_f32, axis=0, keepdims=True)
    ref_f32 = (mask_f32 / jnp.sqrt(row_sum) / jnp.sqrt(col_sum)) @ embed
    assert out.shape == ref_f32.shape

    # Loose check vs pure-f32 reference (covers bf16 input rounding).
    assert jnp.allclose(out, ref_f32, atol=3e-2, rtol=3e-2), \
        float(jnp.max(jnp.abs(out - ref_f32)))

    # Tight check mirroring the kernel's bf16 rounding (col_inv folded into x).
    row_inv_t = 1.0 / jnp.sqrt(row_sum)                       # (B, 1)
    col_inv_t = 1.0 / jnp.sqrt(col_sum)                       # (1, U)
    x_bf = (embed * col_inv_t.T).astype(jnp.bfloat16).astype(jnp.float32)
    m_bf = mask_f32.astype(jnp.bfloat16).astype(jnp.float32)  # exact (0/1)
    ref_bf = (m_bf @ x_bf) * row_inv_t
    assert jnp.allclose(out, ref_bf, atol=5e-3, rtol=5e-3), \
        float(jnp.max(jnp.abs(out - ref_bf)))

    print("KERNEL_OK")
</pallas_src>

<mosaic_0001>
module attributes {stable_mosaic.version = 11 : i64} {
  func.func @gcn_agg_kernel(%arg0: i32, %arg1: i32, %arg2: i32, %arg3: memref<8x128xbf16, #tpu.memory_space<vmem>>, %arg4: memref<128x128xbf16, #tpu.memory_space<vmem>>, %arg5: memref<8x1xf32, #tpu.memory_space<vmem>>, %arg6: memref<8x128xf32, #tpu.memory_space<vmem>>, %arg7: memref<8x128xf32, #tpu.memory_space<vmem>>) attributes {dimension_semantics = [#tpu.dimension_semantics<parallel>, #tpu.dimension_semantics<parallel>, #tpu.dimension_semantics<arbitrary>], iteration_bounds = array<i64: 2, 1, 1>, scalar_prefetch = 0 : i64, scratch_operands = 1 : i64, tpu.core_type = #tpu.core_type<tc>, window_params = [{transform_indices = @transform_0, window_bounds = array<i64: 8, 128>}, {transform_indices = @transform_1, window_bounds = array<i64: 128, 128>}, {transform_indices = @transform_2, window_bounds = array<i64: 8, 1>}, {transform_indices = @transform_3, window_bounds = array<i64: 8, 128>}]} {
    %c0_i32 = arith.constant 0 : i32
    %0 = arith.cmpi eq, %arg2, %c0_i32 : i32
    %1 = arith.extui %0 : i1 to i32
    %c0_i32_0 = arith.constant 0 : i32
    %2 = arith.cmpi ne, %1, %c0_i32_0 : i32
    scf.if %2 {
      %cst_10 = arith.constant 0.000000e+00 : f32
      %12 = vector.broadcast %cst_10 : f32 to vector<8x128xf32>
      %c0_11 = arith.constant 0 : index
      %c0_12 = arith.constant 0 : index
      %13 = vector.load %arg7[%c0_11, %c0_12] : memref<8x128xf32, #tpu.memory_space<vmem>>, vector<8x128xf32>
      tpu.vector_store %arg7[%c0_11, %c0_12], %12 {strides = array<i32>} : memref<8x128xf32, #tpu.memory_space<vmem>>, vector<8x128xf32>,
    } else {
    }
    %c0 = arith.constant 0 : index
    %c0_1 = arith.constant 0 : index
    %3 = vector.load %arg7[%c0, %c0_1] : memref<8x128xf32, #tpu.memory_space<vmem>>, vector<8x128xf32>
    %c0_2 = arith.constant 0 : index
    %c0_3 = arith.constant 0 : index
    %4 = vector.load %arg3[%c0_2, %c0_3] : memref<8x128xbf16, #tpu.memory_space<vmem>>, vector<8x128xbf16>
    %c0_4 = arith.constant 0 : index
    %c0_5 = arith.constant 0 : index
    %5 = vector.load %arg4[%c0_4, %c0_5] : memref<128x128xbf16, #tpu.memory_space<vmem>>, vector<128x128xbf16>
    %cst = arith.constant dense<0.000000e+00> : vector<8x128xf32>
    %6 = tpu.matmul %4, %5, %cst {dimension_numbers = #tpu.dot_dimension_numbers<[1], [0], [0], [1], [0, 0, 1, 1], [], []>} : vector<8x128xbf16>, vector<128x128xbf16>, vector<8x128xf32> -> vector<8x128xf32>
    %7 = arith.addf %3, %6 : vector<8x128xf32>
    %c0_6 = arith.constant 0 : index
    %c0_7 = arith.constant 0 : index
    %8 = vector.load %arg7[%c0_6, %c0_7] : memref<8x128xf32, #tpu.memory_space<vmem>>, vector<8x128xf32>
    tpu.vector_store %arg7[%c0_6, %c0_7], %7 {strides = array<i32>} : memref<8x128xf32, #tpu.memory_space<vmem>>, vector<8x128xf32>,
    %c0_i32_8 = arith.constant 0 : i32
    %9 = arith.cmpi eq, %arg2, %c0_i32_8 : i32
    %10 = arith.extui %9 : i1 to i32
    %c0_i32_9 = arith.constant 0 : i32
    %11 = arith.cmpi ne, %10, %c0_i32_9 : i32
    scf.if %11 {
      %c0_10 = arith.constant 0 : index
      %c0_11 = arith.constant 0 : index
      %12 = vector.load %arg7[%c0_10, %c0_11] : memref<8x128xf32, #tpu.memory_space<vmem>>, vector<8x128xf32>
      %c0_12 = arith.constant 0 : index
      %c0_13 = arith.constant 0 : index
      %13 = vector.load %arg5[%c0_12, %c0_13] : memref<8x1xf32, #tpu.memory_space<vmem>>, vector<8x1xf32>
      %14 = vector.broadcast %13 : vector<8x1xf32> to vector<8x128xf32>
      %15 = arith.mulf %12, %14 : vector<8x128xf32>
      %c0_14 = arith.constant 0 : index
      %c0_15 = arith.constant 0 : index
      %16 = vector.load %arg6[%c0_14, %c0_15] : memref<8x128xf32, #tpu.memory_space<vmem>>, vector<8x128xf32>
      tpu.vector_store %arg6[%c0_14, %c0_15], %15 {strides = array<i32>} : memref<8x128xf32, #tpu.memory_space<vmem>>, vector<8x128xf32>,
    } else {
    }
    return
  }
  func.func @transform_0(%arg0: i32, %arg1: i32, %arg2: i32) -> (i32, i32) {
    %c0_i32 = arith.constant 0 : i32
    return %arg0, %arg2 : i32, i32
  }
  func.func @transform_1(%arg0: i32, %arg1: i32, %arg2: i32) -> (i32, i32) {
    %c0_i32 = arith.constant 0 : i32
    return %arg2, %arg1 : i32, i32
  }
  func.func @transform_2(%arg0: i32, %arg1: i32, %arg2: i32) -> (i32, i32) {
    %c0_i32 = arith.constant 0 : i32
    %c0_i32_0 = arith.constant 0 : i32
    return %arg0, %c0_i32 : i32, i32
  }
  func.func @transform_3(%arg0: i32, %arg1: i32, %arg2: i32) -> (i32, i32) {
    %c0_i32 = arith.constant 0 : i32
    return %arg0, %arg1 : i32, i32
  }
}

</mosaic_0001>

<bundles_post_ra>
// kernel: tpu_custom_call.1
= control target key start
LH: loop header
LB: loop body
LE: loop exit
PB: predicated region body
PF: predicated region fallthrough
CT: control target
= control target key end

     0   :  { %8 = vsyncpa [#allocation4], 0  ;;  %s908_s0 = inlined_call_operand.vmem [shape: bf16[16,128], index: 0, kind: input, shape index: {}]   ;;  %s909_s1 = inlined_call_operand.hbm [shape: bf16[128,128], index: 1, kind: input, shape index: {}]   ;;  %s910_s2 = inlined_call_operand.vmem [shape: f32[16,1], index: 2, kind: input, shape index: {}]   ;;  %s911_s3 = inlined_call_operand.hbm [shape: f32[16,128], index: 3, kind: output, shape index: {}]  }
   0x1   :  { %9 = vsyncpa [#allocation5], 0 }
   0x2   :  { %11 = vsyncpa [#allocation5 + $0x1], 0  ;;  %s755_s12 = smov 0   ;;  %s757_s13 = smov 0  }
   0x3   :  { %s759_s14 = smov 0   ;;  %s761_s15 = smov 0  }
   0x4   :  { %s763_s16 = smov 0   ;;  %s765_s17 = smov 0  }
   0x5 LB: > { %s485_s18 = sadd.s32 4294967295, %s726_s17   ;;  %s486_s19 = sadd.s32 4294967294, %s726_s17   ;;  %s726_s17 = sphi %s765_s17, %s17_s17   ;;  %s722_s16 = sphi %s763_s16, %s929_s16   ;;  %s718_s15 = sphi %s761_s15, %s928_s15   ;;  %s714_s14 = sphi %s759_s14, %s927_s14   ;;  %s710_s13 = sphi %s757_s13, %s926_s13   ;;  %s706_s12 = sphi %s755_s12, %s925_s12  }
   0x6   : > { %s36_s20 = sadd.s32 1, %s722_s16  ;;  %s127_s21 = sadd.s32 1, %s714_s14 }
   0x7   : > { %p38_p0 = scmp.ge.s32.totalorder %s36_s20, 2  ;;  %p137_p1 = scmp.ne.s32.totalorder %s714_s14, %s710_s13 }
   0x8   : > { %p138_p2 = scmp.eq.s32.totalorder %s485_s18, 1  ;;  %p143_p3 = scmp.ne.s32.totalorder %s710_s13, %s706_s12 }
   0x9   : > { %s931_s20 = smov (%p38_p0, %s36_s20), 0  ;;  %p144_p5 = scmp.eq.s32.totalorder %s486_s19, 1 }
   0xa   : > { %p795_p4 = por %p138_p2, %p137_p1  ;;  %s122_s23 = ssub.s32 %s722_s16, %s931_s20 }
   0xb   : > { %p487_p6 = scmp.ge.s32.totalorder %s726_s17, 1  ;;  %p125_p7 = scmp.eq.s32.totalorder %s122_s23, 0 }
   0xc   : > { %s916_s22 = scalar_select %p795_p4, 1, 0 }
   0xd   : > { %p802_p8 = por %p144_p5, %p143_p3  ;;  %p151_p9 = scmp.lt.s32.totalorder %s726_s17, 3 }
   0xe   : > { %s808_s25 = scalar_select %p125_p7, %s714_s14, %s127_s21  }
   0xf   : > { %s917_s24 = scalar_select %p802_p8, 1, 0 }
  0x10   : > { %p810_p10 = pnand %p487_p6, %p151_p9  ;;  %p814_p11 = scmp.eq.s32.totalorder %s485_s18, 0 }
  0x11   : > { %s728_s28 = smov [#allocation3]   ;;  %s616_s6 = scalar_lea.hbm %s909_s1, 1024 }
  0x12   : > { %s918_s26 = scalar_select %p810_p10, 1, 0 }
  0x13   : > { %s919_s27 = scalar_select %p814_p11, 1, 0 }
  0x14   : > { %p542_p12 = pneg %p810_p10  ;;  %s167_s29 = sshll.u32 %s728_s28, 4  ;;  %s168_s29 = int_to_ptr.vmem [resolvable:$true] %s167_s29 }
  0x15   : > { %p617_p0 = scmp.ne.s32.totalorder %s909_s1, %s616_s6  ;;  %p623_p5 = scmp.lt.u32.totalorder %s616_s6, %s909_s1 }
  0x16   : > { %p822_p13 = pnand %p814_p11, %p542_p12 }
  0x18   : > { %p618_p1 = pneg %p822_p13 }
  0x1a   : > { %p619_p2 = pnand %p618_p1, %p617_p0 }
  0x1c   : > { %p620_p3 = pneg %p619_p2 }
  0x1e   : > { %p625_p6 = pnand %p623_p5, %p620_p3 }
  0x20   : > { %628 = shalt.err (!%p625_p6)
}
  0x21   : > { %s629_s11 = scalar_lea.vmem %s168_s29, 1024  ;;  %p637_p8 = scmp.lt.s32.totalorder %s168_s29, %s168_s29 }
  0x22   : > { %p630_p7 = scmp.ne.s32.totalorder %s168_s29, %s629_s11  ;;  %p638_p4 = scmp.lt.s32.totalorder %s629_s11, %s629_s11 }
  0x24   : > { %p632_p9 = pnand %p630_p7, %p618_p1  ;;  %p639_p11 = por %p638_p4, %p637_p8 }
  0x26   : > { %p633_p12 = pneg %p632_p9 }
  0x28   : > { %p640_p10 = pnand %p639_p11, %p633_p12 }
  0x2a   : > { %643 = shalt.err (!%p640_p10)
}
  0x2b   : > { %s729_s18 = smov 64   ;;  %s730_s19 = smov 4  }
  0x2c   : > { %545 = dma.hbm_to_vmem [thread:$0]  (!%p822_p13), %s909_s1, 1024, %s168_s29, [#allocation4], %s729_s18, %s729_s18, %s730_s19  }
  0x2d   : > { %p921_p0 = scmp.ne.s32.totalorder %s918_s26, 0 }
  0x2e   : > { %p922_p2 = scmp.ne.s32.totalorder (!%p921_p0), %s919_s27, 0 }
  0x2f   : > { %200 = sbr.rel (%p921_p0) target bundleno = 316 (0x13c), region = 32 }
  0x36   : > { %697 = dma.done.wait (%p922_p2), [#allocation4], 1024  }
  0x37   : > { %699 = vsyncadd (%p922_p2), [#allocation4], 4294966272  ;;  %v731_v0 = vmov 0.0   ;;  %vm732_vm0 = vmmov 0   ;;  %v733_v1 = vmov 0   ;;  %p230_p4 = scmp.lt.s32.totalorder %s718_s15, 1 }
  0x38   : > { %516 = vmatprep.subr.bf16.mxu0 %v731_v0  ;;  %532 = vmatprep.mubr.msk.bf16.mxu0 %vm732_vm0, %v731_v0  ;;  %v608_v2 = vld [vmem:[#allocation3] sm:$0xff]   ;;  %v609_v3 = vld [vmem:[#allocation3 + $0x8] sm:$0xff]   ;;  %v610_v4 = vld [vmem:[#allocation3 + $0x10] sm:$0xff]   ;;  %s227_s8 = sand.u32 1, %s710_s13   ;;  %s504_s10 = sshll.u32 %s718_s15, 7 }
  0x39   : > { %607 = vset.pattern.permute.xlu0 %v733_v1  ;;  %s231_s28 = scalar_select %p230_p4, %s718_s15, 1  ;;  %517 = vmatpush3.bf16.msra.mxu0 %v608_v2  ;;  %v611_v6 = vld [vmem:[#allocation3 + $0x18] sm:$0xff]   ;;  %v612_v7 = vld [vmem:[#allocation3 + $0x20] sm:$0xff]   ;;  %v613_v8 = vld [vmem:[#allocation3 + $0x28] sm:$0xff]  }
  0x3a   : > { %518 = vmatprep.subr.bf16.mxu0 %v731_v0  ;;  %v614_v9 = vld [vmem:[#allocation3 + $0x30] sm:$0xff]   ;;  %v615_v10 = vld [vmem:[#allocation3 + $0x38] sm:$0xff]   ;;  %s492_s9 = sshll.u32 %s227_s8, 3  ;;  %s861_s23 = scalar_lea.hbm %s911_s3, %s504_s10 }
  0x3b   : > { %s494_s26 = sshll.u32 %s231_s28, 3  ;;  %s493_s4 = sshll.u32 %s231_s28, 2 }
  0x3c   : > { %s241_s27 = scalar_lea.vmem %s910_s2, %s494_s26  ;;  %s236_s7 = scalar_lea.vmem %s908_s0, %s493_s4 }
  0x3d   : > { %519 = vmatpush3.bf16.msra.mxu0 %v609_v3  ;;  %v360_v5 = vld [vmem:[%s241_s27] sm:$0xff]  ;;  %s229_s11 = scalar_lea.vmem [#allocation6], %s492_s9  ;;  %s369_s28 = scalar_lea.sflag [#allocation5], %s227_s8 }
  0x3e   : > { %520 = vmatprep.subr.bf16.mxu0 %v731_v0  ;;  %363 = vperm.xlu0 %607, %v360_v5   ;;  %v249_v11 = vld [vmem:[%s236_s7] sm:$0xf]  ;;  %s383_s18 = sshll.u32 %s229_s11, 4  ;;  %p923_p10 = scmp.ne.s32.totalorder %s916_s22, 0  ;;  %s863_s18 = int_to_ptr.vmem [resolvable:$true] %s383_s18 }
  0x3f   : > { %s644_s15 = scalar_lea.vmem %s863_s18, 128  ;;  %s734_s26 = smov [#allocation6]  }
  0x40   : > { %p645_p8 = scmp.ne.s32.totalorder %s863_s18, %s644_s15  ;;  %s648_s29 = sshll.u32 %s734_s26, 4  ;;  %s649_s29 = int_to_ptr.vmem [resolvable:$false] %s648_s29 }
  0x41   : > { %521 = vmatpush3.bf16.msra.mxu0 %v610_v4  ;;  %s650_s30 = scalar_lea.vmem %s649_s29, 256  ;;  %p651_p1 = scmp.lt.s32.totalorder %s863_s18, %s649_s29 }
  0x42   : > { %522 = vmatprep.subr.bf16.mxu0 %v731_v0  ;;  %p646_p11 = pnand %p645_p8, %p923_p10  ;;  %p652_p3 = scmp.lt.s32.totalorder %s650_s30, %s644_s15 }
  0x44   : > { %p647_p13 = pneg %p646_p11  ;;  %p653_p5 = por %p652_p3, %p651_p1 }
  0x45   : > { %523 = vmatpush3.bf16.msra.mxu0 %v611_v6 }
  0x46   : > { %524 = vmatprep.subr.bf16.mxu0 %v731_v0  ;;  %p654_p6 = pnand %p653_p5, %p647_p13 }
  0x49   : > { %525 = vmatpush3.bf16.msra.mxu0 %v612_v7 }
  0x4a   : > { %526 = vmatprep.subr.bf16.mxu0 %v731_v0 }
  0x4d   : > { %527 = vmatpush3.bf16.msra.mxu0 %v613_v8 }
  0x4e   : > { %528 = vmatprep.subr.bf16.mxu0 %v731_v0 }
  0x51   : > { %529 = vmatpush3.bf16.msra.mxu0 %v614_v9 }
  0x52   : > { %530 = vmatprep.subr.bf16.mxu0 %v731_v0 }
  0x55   : > { %531 = vmatpush3.bf16.msra.mxu0 %v615_v10 }
  0x58   : > { %533 = vmatmul.mubr.bf16.vlgmr.msra.gmra.mrb[0].mxu0 %v249_v11 }
  0xbd   : > { %v364_v12 = vpop.permute.xlu0 %363 }
 0x12b   : > { %v348_v13 = vpop.f32.mrb[0].mxu0 }
 0x12c   : > { %v366_v14 = vmul.f32 %v364_v12, %v348_v13  ;;  %v534_v15 = vpop.f32.mrb[1].mxu0 }
 0x12d   : > { %v351_v16 = vpop.f32.mrb[2].mxu0 }
 0x12e   : > { %367 = vst [vmem:[%s229_s11] sm:$0xff] %v366_v14  ;;  %v535_v17 = vpop.f32.mrb[3].mxu0 }
 0x12f   : > { %657 = shalt.err (!%p654_p6)
}
 0x130   : > { %s658_s27 = scalar_lea.hbm %s861_s23, 128  ;;  %s662_s6 = scalar_lea.hbm %s911_s3, 256 }
 0x131   : > { %p659_p7 = scmp.ne.s32.totalorder %s861_s23, %s658_s27  ;;  %p663_p0 = scmp.lt.u32.totalorder %s861_s23, %s911_s3 }
 0x132   : > { %p664_p2 = scmp.lt.u32.totalorder %s662_s6, %s658_s27  ;;  %p666_p8 = scmp.lt.u32.totalorder %s658_s27, %s861_s23 }
 0x133   : > { %p660_p9 = pnand %p659_p7, %p923_p10 }
 0x134   : > { %p665_p4 = por %p664_p2, %p663_p0 }
 0x135   : > { %p661_p12 = pneg %p660_p9 }
 0x136   : > { %p667_p11 = por %p666_p8, %p665_p4 }
 0x138   : > { %p668_p13 = pnand %p667_p11, %p661_p12 }
 0x13a   : > { %671 = shalt.err (!%p668_p13)
}
 0x13b   : > { %540 = dma.vmem_to_hbm [thread:$0]  (%p923_p10), %s863_s18, 128, %s861_s23, %s369_s28  }
 0x13c PF: > { %p552_p1 = scmp.ge.s32.totalorder %s726_s17, 2  ;;  %s395_s9 = sand.u32 1, %s706_s12  }
 0x13d   : > { %p924_p3 = scmp.ne.s32.totalorder %s917_s24, 0  ;;  %s396_s10 = scalar_lea.sflag [#allocation5], %s395_s9 }
 0x13f   : > { %p547_p5 = pnand %p552_p1, %p924_p3 }
 0x141   : > { %701 = dma.done.wait (!%p547_p5), %s396_s10, 128  }
 0x142   : > { %703 = vsyncadd (!%p547_p5), %s396_s10, 4294967168  ;;  %s17_s17 = sadd.s32 1, %s726_s17   ;;  %s925_s12 = smov %s710_s13 }
 0x143   : > { %p14_p6 = scmp.ge.s32.totalorder %s17_s17, 4   ;;  %s926_s13 = smov %s714_s14 }
 0x144   : > { %s927_s14 = smov %s808_s25  ;;  %s928_s15 = smov %s722_s16 }
 0x145   : > { %s929_s16 = smov %s931_s20  ;;  %16 = sbr.rel (!%p14_p6) target bundleno = 5 (0x5), region = 84 }
 0x14c   :  { %401 = vsyncpa [#allocation4], 1 }
 0x14d   :  { %403 = vsyncpa [#allocation4 + $0x1], 1 }
 0x14e   :  { %404 = vsyncpa [#allocation5], 1 }
 0x14f   :  { %406 = vsyncpa [#allocation5 + $0x1], 1 }

</bundles_post_ra>
